<compile_context>
chip_gen: v7x
topology: tpu7x:2x2x1
jax: 0.10.0
libtpu: 0.0.40
codegen_flags: <defaults>
</compile_context>

<pallas_src>
import math

import jax
import jax.numpy as jnp
from jax.experimental import pallas as pl
from jax.experimental.pallas import tpu as pltpu

block_size = 32 * 4      # max sequence length for the causal mask
dropout = 0.0            # dropout p=0.0 -> identity (no-op)
n_embd = 64 * 3          # C = 192


def _head_kernel(x_ref, wqkv_ref, bqkv_ref, o_ref):
    # x_ref: (Bt, T, C) f32; wqkv_ref: (C, 3H) bf16; bqkv_ref: (1, 3H) f32; o_ref: (Bt, T, H)
    Bt, T, C = x_ref.shape
    H = o_ref.shape[-1]

    # Fused QKV projection: one MXU pass over x with N = 3H (bf16 inputs, f32 accumulate).
    x_bf = x_ref[...].astype(jnp.bfloat16).reshape(Bt * T, C)
    qkv = jnp.dot(x_bf, wqkv_ref[...], preferred_element_type=jnp.float32)
    qkv = qkv + bqkv_ref[...]                     # bias added in f32
    qkv = qkv.reshape(Bt, T, 3 * H)

    q = qkv[:, :, 0 * H:1 * H]   # C**-0.5 already folded into Wq / bq in the wrapper
    k = qkv[:, :, 1 * H:2 * H]
    v = qkv[:, :, 2 * H:3 * H]

    # scores = q @ k^T (contraction over last axes; bf16 MXU inputs, f32 accumulate)
    s = jnp.einsum('bqd,bkd->bqk',
                   q.astype(jnp.bfloat16), k.astype(jnp.bfloat16),
                   preferred_element_type=jnp.float32)

    # Causal mask built in-kernel (no HBM mask input).  The diagonal guarantees one
    # finite entry per row, so -inf is safe (max never -inf).
    row = jax.lax.broadcasted_iota(jnp.int32, (Bt, T, T), 1)
    col = jax.lax.broadcasted_iota(jnp.int32, (Bt, T, T), 2)
    s = jnp.where(row >= col, s, -jnp.inf)

    # Numerically stable softmax; reciprocal on the EUP slot.
    m = jnp.max(s, axis=-1, keepdims=True)
    e = jnp.exp(s - m)
    denom = jnp.sum(e, axis=-1, keepdims=True)
    p = e * pl.reciprocal(denom, approx=True)

    # dropout p=0.0 -> identity

    out = jnp.einsum('bqk,bkd->bqd',
                     p.astype(jnp.bfloat16), v.astype(jnp.bfloat16),
                     preferred_element_type=jnp.float32)
    o_ref[...] = out.astype(o_ref.dtype)


def _pick_batch_tile(B, T, C, H, *, target_rows=256, vmem_budget=20 * 1024 * 1024):
    """Largest divisor of B whose per-step working set fits `vmem_budget`.

    The budget is conservative for v7x (32 MiB scoped default / 64 MiB physical);
    v5e/v6e have more headroom.  If the whole batch fits as one tile and can be
    split into two tiles that each still fill an MXU pass (>= target_rows
    flattened projection rows), split once so the grid has 2 steps for v7x's two
    grid-shardable TensorCores.  No grid>=2 forcing otherwise (useless on v5e/v6e).
    """
    f32, bf16 = 4, 2

    def vmem_est(bt):
        m = bt * T
        blocks = 2 * m * C * f32 + 2 * m * H * f32              # double-buffered x / out
        weights = 2 * (C * 3 * H) * bf16 + 2 * (3 * H) * f32     # w_qkv (bf16) + bias
        live = (m * 3 * H + 2 * bt * T * T + m * H) * f32        # qkv, scores/probs, out
        live += (m * C + 2 * m * H + bt * T * T + m * H) * bf16  # bf16 MXU copies
        return blocks + weights + live

    divisors = [d for d in range(1, B + 1) if B % d == 0]
    fitting = [d for d in divisors if vmem_est(d) <= vmem_budget] or [1]
    bt = max(fitting)
    if bt == B and B % 2 == 0 and (B // 2) * T >= target_rows:
        bt = B // 2
    return bt


def prepare_head_params(wk, bk, wq, bq, wv, bv, *, mxu_dtype=jnp.bfloat16):
    """Fold C**-0.5 into the query projection and fuse Q/K/V weights.

    Call once outside the per-call path (per review: avoid a fixed per-call tax).
    w*: (head_size, C) PyTorch layout; b*: (head_size,).  Returns (w_qkv, b_qkv).
    """
    H, C = wq.shape
    scale = float(C) ** -0.5
    w_qkv = jnp.concatenate([(wq * scale).T, wk.T, wv.T], axis=1).astype(mxu_dtype)  # (C, 3H)
    b_qkv = jnp.concatenate([bq * scale, bk, bv]).astype(jnp.float32).reshape(1, 3 * H)
    return w_qkv, b_qkv


def head_forward(x, w_qkv, b_qkv):
    """x: (B, T, C) f32; w_qkv: (C, 3H) prepared (bf16); b_qkv: (1, 3H) f32 -> (B, T, H)."""
    B, T, C = x.shape
    H = w_qkv.shape[1] // 3

    Bt = _pick_batch_tile(B, T, C, H)
    grid = (B // Bt,)

    return pl.pallas_call(
        _head_kernel,
        out_shape=jax.ShapeDtypeStruct((B, T, H), x.dtype),
        grid_spec=pltpu.PrefetchScalarGridSpec(
            num_scalar_prefetch=0,
            grid=grid,
            in_specs=[
                pl.BlockSpec((Bt, T, C), lambda b: (b, 0, 0)),
                pl.BlockSpec((C, 3 * H), lambda b: (0, 0)),
                pl.BlockSpec((1, 3 * H), lambda b: (0, 0)),
            ],
            out_specs=pl.BlockSpec((Bt, T, H), lambda b: (b, 0, 0)),
        ),
        compiler_params=pltpu.CompilerParams(
            dimension_semantics=("parallel",),
        ),
    )(x, w_qkv, b_qkv)


def _reference(x, wk, bk, wq, bq, wv, bv):
    """Pure-JAX f32 reference mirroring the PyTorch forward exactly."""
    B, T, C = x.shape
    k = x @ wk.T + bk
    q = x @ wq.T + bq
    v = x @ wv.T + bv
    w = (q @ jnp.swapaxes(k, -2, -1)) * (C ** -0.5)
    tril = jnp.tril(jnp.ones((block_size, block_size)))[:T, :T]
    w = jnp.where(tril == 0, -jnp.inf, w)
    w = jax.nn.softmax(w, axis=-1)
    return w @ v


if __name__ == "__main__":
    head_size = 32
    B, T, C = 2, 8, n_embd

    key = jax.random.PRNGKey(0)
    kx, kwk, kbk, kwq, kbq, kwv, kbv = jax.random.split(key, 7)

    x = jax.random.normal(kx, (B, T, C), dtype=jnp.float32)

    # Deterministic nn.Linear-style init: U(-1/sqrt(fan_in), 1/sqrt(fan_in))
    bound = 1.0 / math.sqrt(C)
    wk = jax.random.uniform(kwk, (head_size, C), jnp.float32, -bound, bound)
    bk = jax.random.uniform(kbk, (head_size,), jnp.float32, -bound, bound)
    wq = jax.random.uniform(kwq, (head_size, C), jnp.float32, -bound, bound)
    bq = jax.random.uniform(kbq, (head_size,), jnp.float32, -bound, bound)
    wv = jax.random.uniform(kwv, (head_size, C), jnp.float32, -bound, bound)
    bv = jax.random.uniform(kbv, (head_size,), jnp.float32, -bound, bound)

    # Weight prep done once (hoisted out of the per-call path); forward jitted.
    w_qkv, b_qkv = prepare_head_params(wk, bk, wq, bq, wv, bv)
    head_fwd = jax.jit(head_forward)

    out = head_fwd(x, w_qkv, b_qkv)
    jax.block_until_ready(out)

    ref = _reference(x, wk, bk, wq, bq, wv, bv)
    assert out.shape == (B, T, head_size)
    # Tolerance reflects bf16 MXU operands (f32 accumulate) + approx softmax reciprocal.
    assert jnp.allclose(out, ref, atol=2e-2, rtol=2e-2), "mismatch vs reference"

    print("KERNEL_OK")
</pallas_src>

<mosaic_0001>
module attributes {stable_mosaic.version = 11 : i64} {
  func.func @_head_kernel(%arg0: i32, %arg1: memref<2x8x192xf32, #tpu.memory_space<vmem>>, %arg2: memref<192x96xbf16, #tpu.memory_space<vmem>>, %arg3: memref<1x96xf32, #tpu.memory_space<vmem>>, %arg4: memref<2x8x32xf32, #tpu.memory_space<vmem>>) attributes {dimension_semantics = [#tpu.dimension_semantics<parallel>], iteration_bounds = array<i64: 1>, scalar_prefetch = 0 : i64, scratch_operands = 0 : i64, tpu.core_type = #tpu.core_type<tc>, window_params = [{transform_indices = @transform_0, window_bounds = array<i64: 2, 8, 192>}, {pipeline_mode = #tpu.pipeline_mode<synchronous>, transform_indices = @transform_1, window_bounds = array<i64: 192, 96>}, {pipeline_mode = #tpu.pipeline_mode<synchronous>, transform_indices = @transform_2, window_bounds = array<i64: 1, 96>}, {transform_indices = @transform_3, window_bounds = array<i64: 2, 8, 32>}]} {
    %c0 = arith.constant 0 : index
    %c0_0 = arith.constant 0 : index
    %c0_1 = arith.constant 0 : index
    %0 = vector.load %arg1[%c0, %c0_0, %c0_1] : memref<2x8x192xf32, #tpu.memory_space<vmem>>, vector<2x8x192xf32>
    %1 = arith.truncf %0 : vector<2x8x192xf32> to vector<2x8x192xbf16>
    %2 = vector.shape_cast %1 : vector<2x8x192xbf16> to vector<16x192xbf16>
    %c0_2 = arith.constant 0 : index
    %c0_3 = arith.constant 0 : index
    %3 = vector.load %arg2[%c0_2, %c0_3] : memref<192x96xbf16, #tpu.memory_space<vmem>>, vector<192x96xbf16>
    %cst = arith.constant dense<0.000000e+00> : vector<16x96xf32>
    %4 = tpu.matmul %2, %3, %cst {dimension_numbers = #tpu.dot_dimension_numbers<[1], [0], [0], [1], [0, 0, 1, 1], [], []>} : vector<16x192xbf16>, vector<192x96xbf16>, vector<16x96xf32> -> vector<16x96xf32>
    %c0_4 = arith.constant 0 : index
    %c0_5 = arith.constant 0 : index
    %5 = vector.load %arg3[%c0_4, %c0_5] : memref<1x96xf32, #tpu.memory_space<vmem>>, vector<1x96xf32>
    %6 = vector.broadcast %5 : vector<1x96xf32> to vector<16x96xf32>
    %7 = arith.addf %4, %6 : vector<16x96xf32>
    %8 = vector.shape_cast %7 : vector<16x96xf32> to vector<2x8x96xf32>
    %9 = vector.extract_strided_slice %8 {offsets = [0, 0, 0], sizes = [2, 8, 32], strides = [1, 1, 1]} : vector<2x8x96xf32> to vector<2x8x32xf32>
    %10 = vector.extract_strided_slice %8 {offsets = [0, 0, 32], sizes = [2, 8, 32], strides = [1, 1, 1]} : vector<2x8x96xf32> to vector<2x8x32xf32>
    %11 = vector.extract_strided_slice %8 {offsets = [0, 0, 64], sizes = [2, 8, 32], strides = [1, 1, 1]} : vector<2x8x96xf32> to vector<2x8x32xf32>
    %12 = arith.truncf %9 : vector<2x8x32xf32> to vector<2x8x32xbf16>
    %13 = arith.truncf %10 : vector<2x8x32xf32> to vector<2x8x32xbf16>
    "tpu.trace_start"() <{level = 10 : i32, message = "bqd,bkd->bqk"}> : () -> ()
    %cst_6 = arith.constant dense<0.000000e+00> : vector<2x8x8xf32>
    %14 = tpu.matmul %12, %13, %cst_6 {dimension_numbers = #tpu.dot_dimension_numbers<[2], [2], [1], [1], [0, 0, 0, 1, 1, 1], [0], [0]>} : vector<2x8x32xbf16>, vector<2x8x32xbf16>, vector<2x8x8xf32> -> vector<2x8x8xf32>
    "tpu.trace_stop"() : () -> ()
    %15 = tpu.iota {dimensions = array<i32: 1>} : vector<2x8x8xi32>
    %16 = tpu.iota {dimensions = array<i32: 2>} : vector<2x8x8xi32>
    %17 = arith.cmpi sge, %15, %16 : vector<2x8x8xi32>
    %cst_7 = arith.constant 0xFF800000 : f32
    %18 = vector.broadcast %cst_7 : f32 to vector<2x8x8xf32>
    %19 = arith.select %17, %14, %18 : vector<2x8x8xi1>, vector<2x8x8xf32>
    %cst_8 = arith.constant dense<0xFF800000> : vector<2x8xf32>
    %20 = vector.multi_reduction <maximumf>, %19, %cst_8 [2] : vector<2x8x8xf32> to vector<2x8xf32>
    %21 = vector.shape_cast %20 : vector<2x8xf32> to vector<2x8x1xf32>
    %22 = vector.broadcast %21 : vector<2x8x1xf32> to vector<2x8x8xf32>
    %23 = arith.subf %19, %22 : vector<2x8x8xf32>
    %24 = math.exp %23 : vector<2x8x8xf32>
    %cst_9 = arith.constant dense<0.000000e+00> : vector<2x8xf32>
    %25 = vector.multi_reduction <add>, %24, %cst_9 [2] : vector<2x8x8xf32> to vector<2x8xf32>
    %26 = vector.shape_cast %25 : vector<2x8xf32> to vector<2x8x1xf32>
    %27 = tpu.reciprocal %26 {approx = true} : vector<2x8x1xf32> -> vector<2x8x1xf32>
    %28 = vector.broadcast %27 : vector<2x8x1xf32> to vector<2x8x8xf32>
    %29 = arith.mulf %24, %28 : vector<2x8x8xf32>
    %30 = arith.truncf %29 : vector<2x8x8xf32> to vector<2x8x8xbf16>
    %31 = arith.truncf %11 : vector<2x8x32xf32> to vector<2x8x32xbf16>
    "tpu.trace_start"() <{level = 10 : i32, message = "bqk,bkd->bqd"}> : () -> ()
    %cst_10 = arith.constant dense<0.000000e+00> : vector<2x8x32xf32>
    %32 = tpu.matmul %30, %31, %cst_10 {dimension_numbers = #tpu.dot_dimension_numbers<[2], [1], [1], [2], [0, 0, 0, 1, 1, 2], [0], [0]>} : vector<2x8x8xbf16>, vector<2x8x32xbf16>, vector<2x8x32xf32> -> vector<2x8x32xf32>
    "tpu.trace_stop"() : () -> ()
    %c0_11 = arith.constant 0 : index
    %c0_12 = arith.constant 0 : index
    %c0_13 = arith.constant 0 : index
    %33 = vector.load %arg4[%c0_11, %c0_12, %c0_13] : memref<2x8x32xf32, #tpu.memory_space<vmem>>, vector<2x8x32xf32>
    tpu.vector_store %arg4[%c0_11, %c0_12, %c0_13], %32 {strides = array<i32>} : memref<2x8x32xf32, #tpu.memory_space<vmem>>, vector<2x8x32xf32>,
    return
  }
  func.func @transform_0(%arg0: i32) -> (i32, i32, i32) {
    %c0_i32 = arith.constant 0 : i32
    %c0_i32_0 = arith.constant 0 : i32
    %c0_i32_1 = arith.constant 0 : i32
    return %arg0, %c0_i32, %c0_i32_0 : i32, i32, i32
  }
  func.func @transform_1(%arg0: i32) -> (i32, i32) {
    %c0_i32 = arith.constant 0 : i32
    %c0_i32_0 = arith.constant 0 : i32
    %c0_i32_1 = arith.constant 0 : i32
    return %c0_i32, %c0_i32_0 : i32, i32
  }
  func.func @transform_2(%arg0: i32) -> (i32, i32) {
    %c0_i32 = arith.constant 0 : i32
    %c0_i32_0 = arith.constant 0 : i32
    %c0_i32_1 = arith.constant 0 : i32
    return %c0_i32, %c0_i32_0 : i32, i32
  }
  func.func @transform_3(%arg0: i32) -> (i32, i32, i32) {
    %c0_i32 = arith.constant 0 : i32
    %c0_i32_0 = arith.constant 0 : i32
    %c0_i32_1 = arith.constant 0 : i32
    return %arg0, %c0_i32, %c0_i32_0 : i32, i32, i32
  }
}

</mosaic_0001>

<bundles_post_ra>
// kernel: head_forward.1
= control target key start
LH: loop header
LB: loop body
LE: loop exit
PB: predicated region body
PF: predicated region fallthrough
CT: control target
= control target key end

     0   :  { %8 = vsyncpa [#allocation3], 0  ;;  %s722_s0 = inlined_call_operand.hbm [shape: f32[2,8,192], index: 0, kind: input, shape index: {}]   ;;  %s723_s1 = inlined_call_operand.hbm [shape: bf16[192,96], index: 1, kind: input, shape index: {}]   ;;  %s724_s2 = inlined_call_operand.vmem [shape: f32[1,96], index: 2, kind: input, shape index: {}]   ;;  %s725_s3 = inlined_call_operand.hbm [shape: f32[2,8,32], index: 3, kind: output, shape index: {}]  }
   0x1   :  { %9 = vsyncpa [#allocation6], 0 }
   0x2   :  { %10 = vsyncpa [#allocation4], 0  ;;  %s620_s12 = smov [#allocation2]   ;;  %s548_s16 = scalar_lea.hbm %s722_s0, 512 }
   0x3   :  { %s16_s13 = sshll.u32 %s620_s12, 4  ;;  %p549_p0 = scmp.ne.s32.totalorder %s722_s0, %s548_s16  ;;  %s17_s13 = int_to_ptr.vmem [resolvable:$true] %s16_s13 }
   0x4   :  { %p552_p1 = scmp.lt.u32.totalorder %s548_s16, %s722_s0 }
   0x6   :  { %p554_p2 = pnand %p552_p1, %p549_p0 }
   0x8   :  { %557 = shalt.err (!%p554_p2)
}
   0x9   :  { %s558_s21 = scalar_lea.vmem %s17_s13, 512  ;;  %p563_p4 = scmp.lt.s32.totalorder %s17_s13, %s17_s13 }
   0xa   :  { %p559_p3 = scmp.ne.s32.totalorder %s17_s13, %s558_s21  ;;  %p564_p5 = scmp.lt.s32.totalorder %s558_s21, %s558_s21 }
   0xc   :  { %p565_p6 = por %p564_p5, %p563_p4 }
   0xe   :  { %p566_p7 = pnand %p565_p6, %p559_p3 }
  0x10   :  { %569 = shalt.err (!%p566_p7)
}
  0x11   :  { %s621_s22 = smov 256   ;;  %s622_s23 = smov 16  }
  0x12   :  { %22 = dma.hbm_to_vmem [thread:$0]  %s722_s0, 512, %s17_s13, [#allocation3], %s621_s22, %s621_s22, %s622_s23  }
  0x13   :  { %s623_s26 = smov [#allocation5]   ;;  %s570_s30 = scalar_lea.hbm %s723_s1, 1536 }
  0x14   :  { %s28_s27 = sshll.u32 %s623_s26, 4  ;;  %p571_p8 = scmp.ne.s32.totalorder %s723_s1, %s570_s30  ;;  %s29_s27 = int_to_ptr.vmem [resolvable:$true] %s28_s27 }
  0x15   :  { %p574_p9 = scmp.lt.u32.totalorder %s570_s30, %s723_s1 }
  0x17   :  { %p576_p10 = pnand %p574_p9, %p571_p8 }
  0x19   :  { %579 = shalt.err (!%p576_p10)
}
  0x1a   :  { %s580_s8 = scalar_lea.vmem %s29_s27, 1536  ;;  %p585_p12 = scmp.lt.s32.totalorder %s29_s27, %s29_s27 }
  0x1b   :  { %p581_p11 = scmp.ne.s32.totalorder %s29_s27, %s580_s8  ;;  %p586_p13 = scmp.lt.s32.totalorder %s580_s8, %s580_s8 }
  0x1d   :  { %p587_p0 = por %p586_p13, %p585_p12 }
  0x1f   :  { %p588_p1 = pnand %p587_p0, %p581_p11 }
  0x21   :  { %591 = shalt.err (!%p588_p1)
}
  0x22   :  { %s624_s0 = smov 64   ;;  %s625_s9 = smov 4  }
  0x23   :  { %34 = dma.hbm_to_vmem [thread:$0]  %s723_s1, 1536, %s29_s27, [#allocation6], %s624_s0, %s624_s0, %s625_s9  }
  0x24   :  { %614 = dma.done.wait [#allocation3], 512  }
  0x25   :  { %615 = vsyncadd [#allocation3], 4294966784 }
  0x26   :  { %616 = dma.done.wait [#allocation6], 1536  }
  0x27   :  { %617 = vsyncadd [#allocation6], 4294965760  ;;  %v626_v0 = vmov 0   ;;  %v528_v1 = vld [vmem:[#allocation5] sm:$0xff]   ;;  %v529_v2 = vld [vmem:[#allocation5 + $0x8] sm:$0xff]   ;;  %vm166_vm0 = vcmask 523264   ;;  %v312_v33 = vlaneseq }
  0x28   :  { %170 = vmatprep.subr.bf16.mxu0 %v626_v0  ;;  %v530_v3 = vld [vmem:[#allocation5 + $0x10] sm:$0xff]   ;;  %v531_v4 = vld [vmem:[#allocation5 + $0x18] sm:$0xff]   ;;  %v45_v5 = vld [vmem:[#allocation2 + $0x8] sm:$0xff]  ;;  %v627_v19 = vmov 0.0   ;;  %vm628_vm1 = vmmov 0   ;;  %s629_s13 = smov 96  }
  0x29   :  { %171 = vmatpush1.bf16.msra.mxu0 %v528_v1  ;;  %v47_v6 = vld [vmem:[#allocation2 + $0x18] sm:$0xff]  ;;  %v532_v8 = vld [vmem:[#allocation5 + $0x20] sm:$0xff]   ;;  %v533_v9 = vld [vmem:[#allocation5 + $0x28] sm:$0xff]   ;;  %491 = vmatprep.subr.bf16.mxu1 %v627_v19  ;;  %vm216_vm2 = vcmask 261120   ;;  %v313_v34 = vshrl.u32 %v312_v33, 7  ;;  %v315_v35 = vand.u32 127, %v312_v33 }
  0x2a   :  { %172 = vmatprep.subr.bf16.mxu0 %v626_v0  ;;  %v482_v7 = vpack.c.bf16 %v47_v6, %v45_v5  ;;  %v534_v10 = vld [vmem:[#allocation5 + $0x30] sm:$0xff]   ;;  %v535_v11 = vld [vmem:[#allocation5 + $0x38] sm:$0xff]   ;;  %v536_v12 = vld [vmem:[#allocation5 + $0x40] sm:$0xff]   ;;  %493 = vmatprep.mubr.msk.bf16.mxu1 %vm628_vm1, %v627_v19  ;;  %vm319_vm4 = vcmask 64512   ;;  %vm349_vm5 = vcmask 1043456  }
  0x2b   :  { %v537_v13 = vld [vmem:[#allocation5 + $0x48] sm:$0xff]   ;;  %v538_v14 = vld [vmem:[#allocation5 + $0x50] sm:$0xff]   ;;  %v539_v15 = vld [vmem:[#allocation5 + $0x58] sm:$0xff]   ;;  %vm316_vm3 = vcmp.ge.s32.totalorder %v313_v34, %v315_v35 }
  0x2c   :  { %476 = vmatprep.mubr.msk.bf16.mxu0 %vm166_vm0, %v482_v7  ;;  %v44_v16 = vld [vmem:[#allocation2] sm:$0xff]  ;;  %v46_v17 = vld [vmem:[#allocation2 + $0x10] sm:$0xff] }
  0x2d   :  { %173 = vmatpush1.bf16.msra.mxu0 %v529_v2  ;;  %v481_v18 = vpack.c.bf16 %v46_v17, %v44_v16  ;;  %v461_v20 = vld [vmem:[%s724_s2] ss:$0 sm:$0xff]  ;;  %s630_s2 = smov [#allocation7]  }
  0x2e   :  { %174 = vmatprep.subr.bf16.mxu0 %v626_v0  ;;  %s448_s14 = sshll.u32 %s630_s2, 4  ;;  %s449_s14 = int_to_ptr.vmem [resolvable:$true] %s448_s14 }
  0x2f   :  { %s592_s15 = scalar_lea.vmem %s449_s14, 256  ;;  %p597_p3 = scmp.lt.s32.totalorder %s449_s14, %s449_s14 }
  0x30   :  { %p593_p2 = scmp.ne.s32.totalorder %s449_s14, %s592_s15  ;;  %p598_p4 = scmp.lt.s32.totalorder %s592_s15, %s592_s15 }
  0x31   :  { %175 = vmatpush1.bf16.msra.mxu0 %v530_v3 }
  0x32   :  { %176 = vmatprep.subr.bf16.mxu0 %v626_v0  ;;  %p599_p5 = por %p598_p4, %p597_p3 }
  0x34   :  { %p600_p6 = pnand %p599_p5, %p593_p2 }
  0x35   :  { %177 = vmatpush1.bf16.msra.mxu0 %v531_v4 }
  0x36   :  { %178 = vmatprep.subr.bf16.mxu0 %v626_v0 }
  0x39   :  { %179 = vmatpush1.bf16.msra.mxu0 %v532_v8 }
  0x3a   :  { %180 = vmatprep.subr.bf16.mxu0 %v626_v0 }
  0x3d   :  { %181 = vmatpush1.bf16.msra.mxu0 %v533_v9 }
  0x3e   :  { %182 = vmatprep.subr.bf16.mxu0 %v626_v0 }
  0x41   :  { %183 = vmatpush1.bf16.msra.mxu0 %v534_v10 }
  0x42   :  { %184 = vmatprep.subr.bf16.mxu0 %v626_v0 }
  0x45   :  { %185 = vmatpush1.bf16.msra.mxu0 %v535_v11 }
  0x46   :  { %186 = vmatprep.subr.bf16.mxu0 %v626_v0 }
  0x49   :  { %187 = vmatpush1.bf16.msra.mxu0 %v536_v12 }
  0x4a   :  { %188 = vmatprep.subr.bf16.mxu0 %v626_v0 }
  0x4d   :  { %189 = vmatpush1.bf16.msra.mxu0 %v537_v13 }
  0x4e   :  { %190 = vmatprep.subr.bf16.mxu0 %v626_v0 }
  0x51   :  { %191 = vmatpush1.bf16.msra.mxu0 %v538_v14 }
  0x52   :  { %192 = vmatprep.subr.bf16.mxu0 %v626_v0 }
  0x55   :  { %193 = vmatpush1.bf16.msra.mxu0 %v539_v15 }
  0x58   :  { %203 = vmatmul.mubr.bf16.vlgmr.msra.gmra.mrb[0].mxu0 %v481_v18 }
 0x12b   :  { %v204_v21 = vpop.f32.mrb[0].mxu0 }
 0x12c   :  { %v205_v22 = vadd.f32 %v461_v20, %v204_v21  ;;  %v206_v23 = vpop.f32.mrb[1].mxu0 }
 0x12d   :  { %v207_v24 = vpop.f32.mrb[2].mxu0 }
 0x12e   :  { %v211_v25 = vpack.c.bf16 %v205_v22, %v205_v22  ;;  %v208_v26 = vadd.f32 %v461_v20, %v207_v24  ;;  %v209_v27 = vpop.f32.mrb[3].mxu0 }
 0x130   :  { %214 = vrot.lane.b32.xlu0 %v211_v25, %s629_s13  ;;  %v212_v28 = vpack.c.bf16 %v208_v26, %v208_v26 }
 0x134   :  { %264 = vrot.lane.b32.xlu0 %v212_v28, %s629_s13 }
 0x1a2   :  { %v215_v29 = vpop.permute.xlu0 %214 }
 0x1a3   :  { %v221_v30 = vsel %vm216_vm2, %v215_v29, 0 }
 0x1a4   :  { %492 = vmatpush3.bf16.xpose.msra.mxu1 %v221_v30 }
 0x1a5   :  { %497 = vmatprep.subr.bf16.mxu1 %v627_v19 }
 0x1a6   :  { %v265_v31 = vpop.permute.xlu0 %264 }
 0x1a7   :  { %v270_v32 = vsel %vm216_vm2, %v265_v31, 0 }
 0x1ab   :  { %494 = vmatmul.mubr.msk.bf16.vlgmr.msra.gmra.mrb[0].mxu1 %vm216_vm2, %v211_v25 }
 0x1ac   :  { %498 = vmatpush3.bf16.xpose.msra.mxu1 %v270_v32  ;;  %499 = vmatprep.mubr.msk.bf16.mxu1 %vm628_vm1, %v627_v19 }
 0x1ad   :  { %503 = vmatprep.subr.bf16.mxu1 %v627_v19 }
 0x1b3   :  { %500 = vmatmul.mubr.msk.bf16.vlgmr.msra.gmra.mrb[4].mxu1 %vm216_vm2, %v212_v28 }
 0x1b4   :  { %505 = vmatprep.mubr.msk.bf16.mxu1 %vm628_vm1, %v627_v19 }
 0x27e   :  { %v257_v36 = vpop.f32.mrb[0].mxu1 }
 0x27f   :  { %v317_v37 = vsel %vm316_vm3, %v257_v36, -inf  ;;  %v495_v38 = vpop.f32.mrb[1].mxu1 }
 0x280   :  { %v260_v39 = vpop.f32.mrb[2].mxu1  ;;  %v320_v40 = vsel %vm319_vm4, %v317_v37, -inf }
 0x281   :  { %321 = vmax.xlane.f32.xlu1 %v320_v40  ;;  %v496_v41 = vpop.f32.mrb[3].mxu1 }
 0x286   :  { %v306_v42 = vpop.f32.mrb[4].mxu1 }
 0x287   :  { %v318_v43 = vsel %vm316_vm3, %v306_v42, -inf  ;;  %v501_v44 = vpop.f32.mrb[5].mxu1 }
 0x288   :  { %v309_v45 = vpop.f32.mrb[6].mxu1  ;;  %v323_v46 = vsel %vm319_vm4, %v318_v43, -inf }
 0x289   :  { %324 = vmax.xlane.f32.xlu1 %v323_v46  ;;  %v502_v47 = vpop.f32.mrb[7].mxu1 }
 0x29a   :  { %344 = vrot.lane.b32.xlu1 %v211_v25, %s624_s0 }
 0x30e   :  { %v322_v48 = vpop.xlane.xlu1 %321 }
 0x30f   :  { %v326_v49 = vsub.f32 %v317_v37, %v322_v48 }
 0x311   :  { %v328_v50 = vmul.f32 1.442695, %v326_v49 }
 0x313   :  { %540 = vpow2.f32 %v328_v50 }
 0x316   :  { %v325_v51 = vpop.xlane.xlu1 %324 }
 0x317   :  { %v327_v52 = vsub.f32 %v318_v43, %v325_v51 }
 0x319   :  { %v330_v53 = vmul.f32 1.442695, %v327_v52 }
 0x31a   :  { %v345_v54 = vpop.permute.xlu1 %344 }
 0x31b   :  { %542 = vpow2.f32 %v330_v53  ;;  %v351_v55 = vsel %vm349_vm5, %v345_v54, 0 }
 0x31c   :  { %504 = vmatpush3.bf16.msra.mxu1 %v351_v55 }
 0x31d   :  { %v541_v56 = vpop.eup %540  ;;  %509 = vmatprep.subr.bf16.mxu1 %v627_v19 }
 0x31e   :  { %v332_v57 = vsel %vm319_vm4, %v541_v56, 0.0 }
 0x31f   :  { %333 = vadd.xlane.f32.xlu0 %v332_v57 }
 0x325   :  { %v543_v58 = vpop.eup %542 }
 0x326   :  { %v335_v59 = vsel %vm319_vm4, %v543_v58, 0.0 }
 0x327   :  { %336 = vadd.xlane.f32.xlu1 %v335_v59 }
 0x338   :  { %393 = vrot.lane.b32.xlu1 %v212_v28, %s624_s0 }
 0x3ac   :  { %v334_v60 = vpop.xlane.xlu0 %333 }
 0x3ad   :  { %544 = vrcp.f32 %v334_v60 }
 0x3b4   :  { %v337_v61 = vpop.xlane.xlu1 %336 }
 0x3b5   :  { %546 = vrcp.f32 %v337_v61 }
 0x3b7   :  { %v545_v62 = vpop.eup %544 }
 0x3b8   :  { %v340_v63 = vmul.f32 %v545_v62, %v541_v56  ;;  %v394_v0 = vpop.permute.xlu1 %393 }
 0x3b9   :  { %v399_v2 = vsel %vm349_vm5, %v394_v0, 0 }
 0x3ba   :  { %v342_v1 = vpack.c.bf16 %v340_v63, %v340_v63 }
 0x3bc   :  { %506 = vmatmul.mubr.msk.bf16.vlgmr.msra.gmra.mrb[8].mxu1 %vm319_vm4, %v342_v1 }
 0x3bd   :  { %510 = vmatpush3.bf16.msra.mxu1 %v399_v2  ;;  %511 = vmatprep.mubr.msk.bf16.mxu1 %vm628_vm1, %v627_v19 }
 0x3bf   :  { %v547_v3 = vpop.eup %546 }
 0x3c0   :  { %v341_v4 = vmul.f32 %v547_v3, %v543_v58 }
 0x3c2   :  { %v343_v5 = vpack.c.bf16 %v341_v4, %v341_v4 }
 0x3c4   :  { %512 = vmatmul.mubr.msk.bf16.vlgmr.msra.gmra.mrb[12].mxu1 %vm319_vm4, %v343_v5 }
 0x48f   :  { %v387_v6 = vpop.f32.mrb[8].mxu1 }
 0x490   :  { %441 = vst.msk [vmem:[#allocation7] sm:$0xff] %vm216_vm2, %v387_v6  ;;  %v507_v7 = vpop.f32.mrb[9].mxu1 }
 0x491   :  { %v390_v8 = vpop.f32.mrb[10].mxu1 }
 0x492   :  { %v508_v9 = vpop.f32.mrb[11].mxu1 }
 0x497   :  { %v435_v10 = vpop.f32.mrb[12].mxu1 }
 0x498   :  { %442 = vst.msk [vmem:[#allocation7 + $0x8] sm:$0xff] %vm216_vm2, %v435_v10  ;;  %v513_v11 = vpop.f32.mrb[13].mxu1 }
 0x499   :  { %v438_v12 = vpop.f32.mrb[14].mxu1 }
 0x49a   :  { %603 = shalt.err (!%p600_p6)
}
 0x49b   :  { %s604_s18 = scalar_lea.hbm %s725_s3, 256 }
 0x49c   :  { %p605_p7 = scmp.ne.s32.totalorder %s725_s3, %s604_s18  ;;  %p608_p8 = scmp.lt.u32.totalorder %s604_s18, %s725_s3 }
 0x49e   :  { %p610_p9 = pnand %p608_p8, %p605_p7 }
 0x4a0   :  { %613 = shalt.err (!%p610_p9)
}
 0x4a1   :  { %s631_s23 = smov 128   ;;  %s632_s24 = smov 8   ;;  %v514_v13 = vpop.f32.mrb[15].mxu1 }
 0x4a2   :  { %454 = dma.vmem_to_hbm [thread:$0]  %s449_s14, 256, %s725_s3, [#allocation4], %s631_s23, %s631_s23, %s632_s24  }
 0x4a3   :  { %618 = dma.done.wait [#allocation4], 256  }
 0x4a4   :  { %619 = vsyncadd [#allocation4], 4294967040 }
 0x4a5   :  { %458 = vsyncpa [#allocation3], 1 }
 0x4a6   :  { %459 = vsyncpa [#allocation6], 1 }
 0x4a7   :  { %460 = vsyncpa [#allocation4], 1 }

</bundles_post_ra>
